<compile_context>
chip_gen: v6e
topology: v6e:2x2x1
jax: 0.10.0
libtpu: 0.0.40
codegen_flags: <defaults>
</compile_context>

<pallas_src>
import jax
import jax.numpy as jnp
from jax.experimental import pallas as pl
from jax.experimental.pallas import tpu as pltpu

LANE = 128


def _cdiv(a, b):
    return -(-a // b)


def _round_up(n, m):
    return _cdiv(n, m) * m


def _pad2d(a, rows, cols):
    r, c = a.shape
    return jnp.pad(a, ((0, rows - r), (0, cols - c)))


def decoder_kernel(x_ref, c_ref,
                   w1x_ref, w1c_ref, b1_ref,
                   w2_ref, b2_ref,
                   w3_ref, b3_ref,
                   w4_ref, b4_ref,
                   o_ref):
    # Layer 1: cat([x, c]) @ W1 + b1  ==  x @ W1[:L] + c @ W1[L:] + b1
    h = (jnp.dot(x_ref[...], w1x_ref[...], preferred_element_type=jnp.float32)
         + jnp.dot(c_ref[...], w1c_ref[...], preferred_element_type=jnp.float32)
         + b1_ref[...])
    h = jnp.maximum(h, 0.0)

    # Layer 2
    h = jnp.dot(h, w2_ref[...], preferred_element_type=jnp.float32) + b2_ref[...]
    h = jnp.maximum(h, 0.0)

    # Layer 3
    h = jnp.dot(h, w3_ref[...], preferred_element_type=jnp.float32) + b3_ref[...]
    h = jnp.maximum(h, 0.0)

    # Layer 4 (no activation)
    h = jnp.dot(h, w4_ref[...], preferred_element_type=jnp.float32) + b4_ref[...]

    # Compact store: only the true output_dim lanes go back to HBM.
    o_ref[...] = h[:, : o_ref.shape[-1]].astype(o_ref.dtype)


def decoder_forward(x, c, params, *, batch_tile=4096, out_dtype=jnp.float32):
    """params = ((w1, b1), (w2, b2), (w3, b3), (w4, b4)).

    w_i: [in_features, out_features] (transpose of torch nn.Linear.weight),
    b_i: [out_features] or [1, out_features].  Returns [B, output_dim].
    """
    (w1, b1), (w2, b2), (w3, b3), (w4, b4) = params

    x = x.astype(jnp.float32)
    c = c.astype(jnp.float32)
    B, latent_dim = x.shape
    cond_dim = c.shape[1]
    h1, h2, h3, output_dim = w1.shape[1], w2.shape[1], w3.shape[1], w4.shape[1]

    # Lane-dense padded hidden widths (exact: zero padding survives bias+ReLU).
    h1p = _round_up(h1, LANE)
    h2p = _round_up(h2, LANE)
    h3p = _round_up(h3, LANE)
    outp = _round_up(output_dim, LANE)

    f32 = jnp.float32
    w1 = w1.astype(f32)
    w1x = _pad2d(w1[:latent_dim, :], latent_dim, h1p)   # no in-kernel concat
    w1c = _pad2d(w1[latent_dim:, :], cond_dim, h1p)
    b1p = _pad2d(b1.astype(f32).reshape(1, -1), 1, h1p)
    w2p = _pad2d(w2.astype(f32), h1p, h2p)
    b2p = _pad2d(b2.astype(f32).reshape(1, -1), 1, h2p)
    w3p = _pad2d(w3.astype(f32), h2p, h3p)
    b3p = _pad2d(b3.astype(f32).reshape(1, -1), 1, h3p)
    w4p = _pad2d(w4.astype(f32), h3p, outp)
    b4p = _pad2d(b4.astype(f32).reshape(1, -1), 1, outp)

    # Even-split batch tiling: minimal padding waste, tb multiple of 8 sublanes.
    n_tiles = max(1, _cdiv(B, batch_tile))
    tb = _round_up(_cdiv(B, n_tiles), 8)
    grid_n = _cdiv(B, tb)
    bp = grid_n * tb
    if bp > B:
        # Inputs padded so reads are always in-bounds; the padded rows of the
        # final (ragged) output block are simply not written back.
        x = jnp.pad(x, ((0, bp - B), (0, 0)))
        c = jnp.pad(c, ((0, bp - B), (0, 0)))

    def batch_spec(feat):
        return pl.BlockSpec((tb, feat), lambda i: (i, 0))

    def resident_spec(arr):
        # Full-array block, constant index_map -> stays VMEM-resident across steps.
        return pl.BlockSpec(arr.shape, lambda i: (0, 0))

    flops = 2 * bp * (latent_dim * h1p + cond_dim * h1p
                      + h1p * h2p + h2p * h3p + h3p * outp)
    bytes_accessed = (
        bp * (latent_dim + cond_dim) * 4                      # streamed inputs
        + B * output_dim * jnp.dtype(out_dtype).itemsize      # compact output
        + sum(int(a.size) * 4
              for a in (w1x, w1c, b1p, w2p, b2p, w3p, b3p, w4p, b4p))
    )
    cost = pl.CostEstimate(flops=int(flops), transcendentals=0,
                           bytes_accessed=int(bytes_accessed))

    out = pl.pallas_call(
        decoder_kernel,
        out_shape=jax.ShapeDtypeStruct((B, output_dim), out_dtype),
        grid=(grid_n,),
        in_specs=[
            batch_spec(latent_dim), batch_spec(cond_dim),
            resident_spec(w1x), resident_spec(w1c), resident_spec(b1p),
            resident_spec(w2p), resident_spec(b2p),
            resident_spec(w3p), resident_spec(b3p),
            resident_spec(w4p), resident_spec(b4p),
        ],
        out_specs=pl.BlockSpec((tb, output_dim), lambda i: (i, 0)),
        compiler_params=pltpu.CompilerParams(
            dimension_semantics=("parallel",),
            vmem_limit_bytes=32 * 1024 * 1024,
        ),
        cost_estimate=cost,
    )(x, c, w1x, w1c, b1p, w2p, b2p, w3p, b3p, w4p, b4p)

    return out


def init_decoder_params(key, latent_dim, conditional_dim, output_dim):
    """Deterministic init mimicking torch.nn.Linear default (uniform +-1/sqrt(fan_in))."""
    dims = [latent_dim + conditional_dim, 16, 32, 32, output_dim]
    params = []
    for i in range(4):
        key, kw, kb = jax.random.split(key, 3)
        fan_in, fan_out = dims[i], dims[i + 1]
        bound = 1.0 / jnp.sqrt(jnp.float32(fan_in))
        w = jax.random.uniform(kw, (fan_in, fan_out), jnp.float32, -bound, bound)
        b = jax.random.uniform(kb, (1, fan_out), jnp.float32, -bound, bound)
        params.append((w, b))
    return tuple(params)


def decoder_reference(x, c, params):
    """Plain-JAX reference for correctness checking."""
    h = jnp.concatenate([x.astype(jnp.float32), c.astype(jnp.float32)], axis=-1)
    for i, (w, b) in enumerate(params):
        h = h @ w + b.reshape(1, -1)
        if i < 3:
            h = jnp.maximum(h, 0.0)
    return h


if __name__ == "__main__":
    # Small shapes consistent with the module's forward pass.
    B = 8
    latent_dim = 8
    conditional_dim = 4
    output_dim = 10

    key = jax.random.PRNGKey(0)
    key, kx, kc = jax.random.split(key, 3)
    x = jax.random.normal(kx, (B, latent_dim), jnp.float32)
    c = jax.random.normal(kc, (B, conditional_dim), jnp.float32)

    params = init_decoder_params(key, latent_dim, conditional_dim, output_dim)

    out = decoder_forward(x, c, params)
    out = jax.block_until_ready(out)

    ref = decoder_reference(x, c, params)
    assert out.shape == (B, output_dim)
    assert jnp.allclose(out, ref, atol=1e-5, rtol=1e-5), "mismatch vs reference"

    print("KERNEL_OK")
</pallas_src>

<mosaic_0001>
module attributes {stable_mosaic.version = 11 : i64} {
  func.func @decoder_kernel(%arg0: i32, %arg1: memref<8x8xf32, #tpu.memory_space<vmem>>, %arg2: memref<8x4xf32, #tpu.memory_space<vmem>>, %arg3: memref<8x128xf32, #tpu.memory_space<vmem>>, %arg4: memref<4x128xf32, #tpu.memory_space<vmem>>, %arg5: memref<1x128xf32, #tpu.memory_space<vmem>>, %arg6: memref<128x128xf32, #tpu.memory_space<vmem>>, %arg7: memref<1x128xf32, #tpu.memory_space<vmem>>, %arg8: memref<128x128xf32, #tpu.memory_space<vmem>>, %arg9: memref<1x128xf32, #tpu.memory_space<vmem>>, %arg10: memref<128x128xf32, #tpu.memory_space<vmem>>, %arg11: memref<1x128xf32, #tpu.memory_space<vmem>>, %arg12: memref<8x10xf32, #tpu.memory_space<vmem>>) attributes {dimension_semantics = [#tpu.dimension_semantics<parallel>], iteration_bounds = array<i64: 1>, scalar_prefetch = 0 : i64, scratch_operands = 0 : i64, tpu.core_type = #tpu.core_type<tc>, window_params = [{transform_indices = @transform_0, window_bounds = array<i64: 8, 8>}, {transform_indices = @transform_1, window_bounds = array<i64: 8, 4>}, {pipeline_mode = #tpu.pipeline_mode<synchronous>, transform_indices = @transform_2, window_bounds = array<i64: 8, 128>}, {pipeline_mode = #tpu.pipeline_mode<synchronous>, transform_indices = @transform_3, window_bounds = array<i64: 4, 128>}, {pipeline_mode = #tpu.pipeline_mode<synchronous>, transform_indices = @transform_4, window_bounds = array<i64: 1, 128>}, {pipeline_mode = #tpu.pipeline_mode<synchronous>, transform_indices = @transform_5, window_bounds = array<i64: 128, 128>}, {pipeline_mode = #tpu.pipeline_mode<synchronous>, transform_indices = @transform_6, window_bounds = array<i64: 1, 128>}, {pipeline_mode = #tpu.pipeline_mode<synchronous>, transform_indices = @transform_7, window_bounds = array<i64: 128, 128>}, {pipeline_mode = #tpu.pipeline_mode<synchronous>, transform_indices = @transform_8, window_bounds = array<i64: 1, 128>}, {pipeline_mode = #tpu.pipeline_mode<synchronous>, transform_indices = @transform_9, window_bounds = array<i64: 128, 128>}, {pipeline_mode = #tpu.pipeline_mode<synchronous>, transform_indices = @transform_10, window_bounds = array<i64: 1, 128>}, {transform_indices = @transform_11, window_bounds = array<i64: 8, 10>}]} {
    %c0 = arith.constant 0 : index
    %c0_0 = arith.constant 0 : index
    %0 = vector.load %arg1[%c0, %c0_0] : memref<8x8xf32, #tpu.memory_space<vmem>>, vector<8x8xf32>
    %c0_1 = arith.constant 0 : index
    %c0_2 = arith.constant 0 : index
    %1 = vector.load %arg3[%c0_1, %c0_2] : memref<8x128xf32, #tpu.memory_space<vmem>>, vector<8x128xf32>
    %cst = arith.constant dense<0.000000e+00> : vector<8x128xf32>
    %2 = tpu.matmul %0, %1, %cst {dimension_numbers = #tpu.dot_dimension_numbers<[1], [0], [0], [1], [0, 0, 1, 1], [], []>} : vector<8x8xf32>, vector<8x128xf32>, vector<8x128xf32> -> vector<8x128xf32>
    %c0_3 = arith.constant 0 : index
    %c0_4 = arith.constant 0 : index
    %3 = vector.load %arg2[%c0_3, %c0_4] : memref<8x4xf32, #tpu.memory_space<vmem>>, vector<8x4xf32>
    %c0_5 = arith.constant 0 : index
    %c0_6 = arith.constant 0 : index
    %4 = vector.load %arg4[%c0_5, %c0_6] : memref<4x128xf32, #tpu.memory_space<vmem>>, vector<4x128xf32>
    %cst_7 = arith.constant dense<0.000000e+00> : vector<8x128xf32>
    %5 = tpu.matmul %3, %4, %cst_7 {dimension_numbers = #tpu.dot_dimension_numbers<[1], [0], [0], [1], [0, 0, 1, 1], [], []>} : vector<8x4xf32>, vector<4x128xf32>, vector<8x128xf32> -> vector<8x128xf32>
    %6 = arith.addf %2, %5 : vector<8x128xf32>
    %c0_8 = arith.constant 0 : index
    %c0_9 = arith.constant 0 : index
    %7 = vector.load %arg5[%c0_8, %c0_9] : memref<1x128xf32, #tpu.memory_space<vmem>>, vector<1x128xf32>
    %8 = vector.broadcast %7 : vector<1x128xf32> to vector<8x128xf32>
    %9 = arith.addf %6, %8 : vector<8x128xf32>
    %cst_10 = arith.constant 0.000000e+00 : f32
    %10 = vector.broadcast %cst_10 : f32 to vector<8x128xf32>
    %11 = arith.maximumf %9, %10 : vector<8x128xf32>
    %c0_11 = arith.constant 0 : index
    %c0_12 = arith.constant 0 : index
    %12 = vector.load %arg6[%c0_11, %c0_12] : memref<128x128xf32, #tpu.memory_space<vmem>>, vector<128x128xf32>
    %cst_13 = arith.constant dense<0.000000e+00> : vector<8x128xf32>
    %13 = tpu.matmul %11, %12, %cst_13 {dimension_numbers = #tpu.dot_dimension_numbers<[1], [0], [0], [1], [0, 0, 1, 1], [], []>} : vector<8x128xf32>, vector<128x128xf32>, vector<8x128xf32> -> vector<8x128xf32>
    %c0_14 = arith.constant 0 : index
    %c0_15 = arith.constant 0 : index
    %14 = vector.load %arg7[%c0_14, %c0_15] : memref<1x128xf32, #tpu.memory_space<vmem>>, vector<1x128xf32>
    %15 = vector.broadcast %14 : vector<1x128xf32> to vector<8x128xf32>
    %16 = arith.addf %13, %15 : vector<8x128xf32>
    %cst_16 = arith.constant 0.000000e+00 : f32
    %17 = vector.broadcast %cst_16 : f32 to vector<8x128xf32>
    %18 = arith.maximumf %16, %17 : vector<8x128xf32>
    %c0_17 = arith.constant 0 : index
    %c0_18 = arith.constant 0 : index
    %19 = vector.load %arg8[%c0_17, %c0_18] : memref<128x128xf32, #tpu.memory_space<vmem>>, vector<128x128xf32>
    %cst_19 = arith.constant dense<0.000000e+00> : vector<8x128xf32>
    %20 = tpu.matmul %18, %19, %cst_19 {dimension_numbers = #tpu.dot_dimension_numbers<[1], [0], [0], [1], [0, 0, 1, 1], [], []>} : vector<8x128xf32>, vector<128x128xf32>, vector<8x128xf32> -> vector<8x128xf32>
    %c0_20 = arith.constant 0 : index
    %c0_21 = arith.constant 0 : index
    %21 = vector.load %arg9[%c0_20, %c0_21] : memref<1x128xf32, #tpu.memory_space<vmem>>, vector<1x128xf32>
    %22 = vector.broadcast %21 : vector<1x128xf32> to vector<8x128xf32>
    %23 = arith.addf %20, %22 : vector<8x128xf32>
    %cst_22 = arith.constant 0.000000e+00 : f32
    %24 = vector.broadcast %cst_22 : f32 to vector<8x128xf32>
    %25 = arith.maximumf %23, %24 : vector<8x128xf32>
    %c0_23 = arith.constant 0 : index
    %c0_24 = arith.constant 0 : index
    %26 = vector.load %arg10[%c0_23, %c0_24] : memref<128x128xf32, #tpu.memory_space<vmem>>, vector<128x128xf32>
    %cst_25 = arith.constant dense<0.000000e+00> : vector<8x128xf32>
    %27 = tpu.matmul %25, %26, %cst_25 {dimension_numbers = #tpu.dot_dimension_numbers<[1], [0], [0], [1], [0, 0, 1, 1], [], []>} : vector<8x128xf32>, vector<128x128xf32>, vector<8x128xf32> -> vector<8x128xf32>
    %c0_26 = arith.constant 0 : index
    %c0_27 = arith.constant 0 : index
    %28 = vector.load %arg11[%c0_26, %c0_27] : memref<1x128xf32, #tpu.memory_space<vmem>>, vector<1x128xf32>
    %29 = vector.broadcast %28 : vector<1x128xf32> to vector<8x128xf32>
    %30 = arith.addf %27, %29 : vector<8x128xf32>
    %31 = vector.extract_strided_slice %30 {offsets = [0, 0], sizes = [8, 10], strides = [1, 1]} : vector<8x128xf32> to vector<8x10xf32>
    %c0_28 = arith.constant 0 : index
    %c0_29 = arith.constant 0 : index
    %32 = vector.load %arg12[%c0_28, %c0_29] : memref<8x10xf32, #tpu.memory_space<vmem>>, vector<8x10xf32>
    tpu.vector_store %arg12[%c0_28, %c0_29], %31 {strides = array<i32>} : memref<8x10xf32, #tpu.memory_space<vmem>>, vector<8x10xf32>,
    return
  }
  func.func @transform_0(%arg0: i32) -> (i32, i32) {
    %c0_i32 = arith.constant 0 : i32
    %c0_i32_0 = arith.constant 0 : i32
    return %arg0, %c0_i32 : i32, i32
  }
  func.func @transform_1(%arg0: i32) -> (i32, i32) {
    %c0_i32 = arith.constant 0 : i32
    %c0_i32_0 = arith.constant 0 : i32
    return %arg0, %c0_i32 : i32, i32
  }
  func.func @transform_2(%arg0: i32) -> (i32, i32) {
    %c0_i32 = arith.constant 0 : i32
    %c0_i32_0 = arith.constant 0 : i32
    %c0_i32_1 = arith.constant 0 : i32
    return %c0_i32, %c0_i32_0 : i32, i32
  }
  func.func @transform_3(%arg0: i32) -> (i32, i32) {
    %c0_i32 = arith.constant 0 : i32
    %c0_i32_0 = arith.constant 0 : i32
    %c0_i32_1 = arith.constant 0 : i32
    return %c0_i32, %c0_i32_0 : i32, i32
  }
  func.func @transform_4(%arg0: i32) -> (i32, i32) {
    %c0_i32 = arith.constant 0 : i32
    %c0_i32_0 = arith.constant 0 : i32
    %c0_i32_1 = arith.constant 0 : i32
    return %c0_i32, %c0_i32_0 : i32, i32
  }
  func.func @transform_5(%arg0: i32) -> (i32, i32) {
    %c0_i32 = arith.constant 0 : i32
    %c0_i32_0 = arith.constant 0 : i32
    %c0_i32_1 = arith.constant 0 : i32
    return %c0_i32, %c0_i32_0 : i32, i32
  }
  func.func @transform_6(%arg0: i32) -> (i32, i32) {
    %c0_i32 = arith.constant 0 : i32
    %c0_i32_0 = arith.constant 0 : i32
    %c0_i32_1 = arith.constant 0 : i32
    return %c0_i32, %c0_i32_0 : i32, i32
  }
  func.func @transform_7(%arg0: i32) -> (i32, i32) {
    %c0_i32 = arith.constant 0 : i32
    %c0_i32_0 = arith.constant 0 : i32
    %c0_i32_1 = arith.constant 0 : i32
    return %c0_i32, %c0_i32_0 : i32, i32
  }
  func.func @transform_8(%arg0: i32) -> (i32, i32) {
    %c0_i32 = arith.constant 0 : i32
    %c0_i32_0 = arith.constant 0 : i32
    %c0_i32_1 = arith.constant 0 : i32
    return %c0_i32, %c0_i32_0 : i32, i32
  }
  func.func @transform_9(%arg0: i32) -> (i32, i32) {
    %c0_i32 = arith.constant 0 : i32
    %c0_i32_0 = arith.constant 0 : i32
    %c0_i32_1 = arith.constant 0 : i32
    return %c0_i32, %c0_i32_0 : i32, i32
  }
  func.func @transform_10(%arg0: i32) -> (i32, i32) {
    %c0_i32 = arith.constant 0 : i32
    %c0_i32_0 = arith.constant 0 : i32
    %c0_i32_1 = arith.constant 0 : i32
    return %c0_i32, %c0_i32_0 : i32, i32
  }
  func.func @transform_11(%arg0: i32) -> (i32, i32) {
    %c0_i32 = arith.constant 0 : i32
    %c0_i32_0 = arith.constant 0 : i32
    return %arg0, %c0_i32 : i32, i32
  }
}

</mosaic_0001>

<bundles_post_ra>
// kernel: tpu_custom_call.1
= control target key start
LH: loop header
LB: loop body
LE: loop exit
PB: predicated region body
PF: predicated region fallthrough
CT: control target
= control target key end

     0   :  { %16 = vsyncpa [#allocation3], 0  ;;  %s1025_s0 = inlined_call_operand.vmem [shape: f32[8,8], index: 0, kind: input, shape index: {}]   ;;  %s1026_s1 = inlined_call_operand.vmem [shape: f32[8,4], index: 1, kind: input, shape index: {}]   ;;  %s1027_s2 = inlined_call_operand.hbm [shape: f32[8,128], index: 2, kind: input, shape index: {}]   ;;  %s1028_s3 = inlined_call_operand.vmem [shape: f32[4,128], index: 3, kind: input, shape index: {}]   ;;  %s1029_s4 = inlined_call_operand.vmem [shape: f32[1,128], index: 4, kind: input, shape index: {}]   ;;  %s1030_s5 = inlined_call_operand.hbm [shape: f32[128,128], index: 5, kind: input, shape index: {}]   ;;  %s1031_s6 = inlined_call_operand.vmem [shape: f32[1,128], index: 6, kind: input, shape index: {}]   ;;  %s1032_s7 = inlined_call_operand.hbm [shape: f32[128,128], index: 7, kind: input, shape index: {}]   ;;  %s1033_s8 = inlined_call_operand.vmem [shape: f32[1,128], index: 8, kind: input, shape index: {}]   ;;  %s1034_s9 = inlined_call_operand.hbm [shape: f32[128,128], index: 9, kind: input, shape index: {}]   ;;  %s1035_s10 = inlined_call_operand.vmem [shape: f32[1,128], index: 10, kind: input, shape index: {}]   ;;  %s1036_s11 = inlined_call_operand.hbm [shape: f32[8,10], index: 11, kind: output, shape index: {}]  }
   0x1   :  { %17 = vsyncpa [#allocation6], 0 }
   0x2   :  { %18 = vsyncpa [#allocation9], 0 }
   0x3   :  { %19 = vsyncpa [#allocation4], 0  ;;  %s851_s17 = smov [#allocation5]  }
   0x4   :  { %s43_s18 = sshll.u32 %s851_s17, 4  ;;  %s44_s18 = int_to_ptr.vmem [resolvable:$true] %s43_s18 }
   0x5   :  { %s751_s19 = scalar_lea.vmem %s44_s18, 2048  ;;  %p756_p1 = scmp.lt.s32.totalorder %s44_s18, %s44_s18 }
   0x6   :  { %p752_p0 = scmp.ne.s32.totalorder %s44_s18, %s751_s19  ;;  %p757_p2 = scmp.lt.s32.totalorder %s751_s19, %s751_s19 }
   0x8   :  { %p758_p3 = por %p757_p2, %p756_p1 }
   0xa   :  { %p759_p4 = pnand %p758_p3, %p752_p0 }
   0xc   :  { %762 = shalt.err (!%p759_p4)
}
   0xd   :  { %s852_s20 = smov 128   ;;  %s853_s21 = smov 8  }
   0xe   :  { %49 = dma.hbm_to_vmem [thread:$0]  %s1030_s5, 2048, %s44_s18, [#allocation6], %s852_s20, %s852_s20, %s853_s21  }
   0xf   :  { %s854_s24 = smov [#allocation2]   ;;  %s855_s26 = smov [#allocation7]  }
  0x10   :  { %s30_s25 = sshll.u32 %s854_s24, 4  ;;  %s57_s27 = sshll.u32 %s855_s26, 4  ;;  %s31_s25 = int_to_ptr.vmem [resolvable:$true] %s30_s25  ;;  %s58_s27 = int_to_ptr.vmem [resolvable:$true] %s57_s27 }
  0x11   :  { %s771_s28 = scalar_lea.vmem %s31_s25, 128  ;;  %p776_p6 = scmp.lt.s32.totalorder %s31_s25, %s31_s25 }
  0x12   :  { %p772_p5 = scmp.ne.s32.totalorder %s31_s25, %s771_s28  ;;  %p777_p7 = scmp.lt.s32.totalorder %s771_s28, %s771_s28 }
  0x14   :  { %p778_p8 = por %p777_p7, %p776_p6 }
  0x16   :  { %p779_p9 = pnand %p778_p8, %p772_p5 }
  0x18   :  { %782 = shalt.err (!%p779_p9)
}
  0x19   :  { %33 = dma.hbm_to_vmem [thread:$0]  %s1027_s2, 128, %s31_s25, [#allocation3]  }
  0x1a   :  { %s791_s12 = scalar_lea.vmem %s58_s27, 2048  ;;  %p796_p11 = scmp.lt.s32.totalorder %s58_s27, %s58_s27 }
  0x1b   :  { %p792_p10 = scmp.ne.s32.totalorder %s58_s27, %s791_s12  ;;  %p797_p12 = scmp.lt.s32.totalorder %s791_s12, %s791_s12 }
  0x1d   :  { %p798_p13 = por %p797_p12, %p796_p11 }
  0x1f   :  { %p799_p0 = pnand %p798_p13, %p792_p10 }
  0x21   :  { %802 = shalt.err (!%p799_p0)
}
  0x22   :  { %63 = dma.hbm_to_vmem [thread:$0]  %s1032_s7, 2048, %s58_s27, [#allocation6], %s852_s20, %s852_s20, %s853_s21  }
  0x23   :  { %s856_s14 = smov [#allocation8]  }
  0x24   :  { %s71_s15 = sshll.u32 %s856_s14, 4  ;;  %s72_s15 = int_to_ptr.vmem [resolvable:$true] %s71_s15 }
  0x25   :  { %s811_s16 = scalar_lea.vmem %s72_s15, 2048  ;;  %p816_p2 = scmp.lt.s32.totalorder %s72_s15, %s72_s15 }
  0x26   :  { %p812_p1 = scmp.ne.s32.totalorder %s72_s15, %s811_s16  ;;  %p817_p3 = scmp.lt.s32.totalorder %s811_s16, %s811_s16 }
  0x28   :  { %p818_p4 = por %p817_p3, %p816_p2 }
  0x2a   :  { %p819_p5 = pnand %p818_p4, %p812_p1 }
  0x2c   :  { %822 = shalt.err (!%p819_p5)
}
  0x2d   :  { %77 = dma.hbm_to_vmem [thread:$0]  %s1034_s9, 2048, %s72_s15, [#allocation9], %s852_s20, %s852_s20, %s853_s21  }
  0x2e   :  { %843 = dma.done.wait [#allocation3], 128  }
  0x2f   :  { %844 = vsyncadd [#allocation3], 4294967168 }
  0x30   :  { %845 = dma.done.wait [#allocation6], 4096  }
  0x31   :  { %846 = vsyncadd [#allocation6], 4294963200 }
  0x32   :  { %847 = dma.done.wait [#allocation9], 2048  }
  0x33   :  { %848 = vsyncadd [#allocation9], 4294965248  ;;  %v857_v0 = vmov 0.0   ;;  %vm858_vm0 = vmmov 0   ;;  %vm100_vm1 = vcmask 1043456   ;;  %vm96_vm2 = vcmask 31744  }
  0x34   :  { %619 = vmatprep.subr.mxu1 %v857_v0  ;;  %621 = vmatprep.mubr.msk.f32.mxu1 %vm858_vm0, %v857_v0  ;;  %v95_v1 = vld [vmem:[%s1028_s3] sm:$0xf]  ;;  %vm174_vm3 = vcmask 64512   ;;  %v271_v6 = vld [vmem:[#allocation5 + $0x70] sm:$0xff]  ;;  %v270_v7 = vld [vmem:[#allocation5 + $0x68] sm:$0xff]  ;;  %s859_s25 = smov [#allocation10]  }
  0x35   :  { %629 = vmatprep.subr.mxu0 %v857_v0  ;;  %661 = vmatprep.mubr.msk.f32.mxu0 %vm858_vm0, %v857_v0  ;;  %v94_v2 = vld [vmem:[%s1026_s1] sm:$0xff]  ;;  %v269_v8 = vld [vmem:[#allocation5 + $0x60] sm:$0xff]  ;;  %v267_v10 = vld [vmem:[#allocation5 + $0x50] sm:$0xff]  ;;  %s546_s26 = sshll.u32 %s859_s25, 4  ;;  %vm538_vm4 = vcmask 80896   ;;  %s547_s26 = int_to_ptr.vmem [resolvable:$true] %s546_s26 }
  0x36   :  { %v93_v3 = vld [vmem:[#allocation2] sm:$0xff]  ;;  %620 = vmatpush3.msk.msra.mxu1 %vm100_vm1, %v95_v1  ;;  %v266_v11 = vld [vmem:[#allocation5 + $0x48] sm:$0xff]  ;;  %v265_v12 = vld [vmem:[#allocation5 + $0x40] sm:$0xff]  ;;  %s823_s27 = scalar_lea.vmem %s547_s26, 128  ;;  %p828_p7 = scmp.lt.s32.totalorder %s547_s26, %s547_s26 }
  0x37   :  { %v272_v4 = vld [vmem:[#allocation5 + $0x78] sm:$0xff]  ;;  %622 = vmatmul.mubr.msk.f32.vlgmr.msra.gmra.mxu1 %vm96_vm2, %v94_v2  ;;  %624 = vmatprep.subr.mxu1 %v857_v0  ;;  %v263_v14 = vld [vmem:[#allocation5 + $0x30] sm:$0xff]  ;;  %v262_v15 = vld [vmem:[#allocation5 + $0x28] sm:$0xff]  ;;  %p824_p6 = scmp.ne.s32.totalorder %s547_s26, %s823_s27  ;;  %p829_p8 = scmp.lt.s32.totalorder %s823_s27, %s823_s27 }
  0x38   :  { %625 = vmatpush3.msra.mxu1 %v93_v3  ;;  %626 = vmatprep.mubr.msk.f32.mxu1 %vm858_vm0, %v857_v0  ;;  %v92_v5 = vld [vmem:[%s1025_s0] sm:$0xff]  ;;  %v261_v16 = vld [vmem:[#allocation5 + $0x20] sm:$0xff]  ;;  %v259_v18 = vld [vmem:[#allocation5 + $0x10] sm:$0xff] }
  0x39   :  { %630 = vmatpush3.msra.mxu0 %v272_v4  ;;  %664 = vmatprep.subr.mxu1 %v857_v0  ;;  %v268_v9 = vld [vmem:[#allocation5 + $0x58] sm:$0xff]  ;;  %v258_v19 = vld [vmem:[#allocation5 + $0x8] sm:$0xff]  ;;  %v257_v20 = vld [vmem:[#allocation5] sm:$0xff]  ;;  %p830_p9 = por %p829_p8, %p828_p7 }
  0x3a   :  { %631 = vmatprep.subr.mxu0 %v857_v0  ;;  %v264_v13 = vld [vmem:[#allocation5 + $0x38] sm:$0xff]  ;;  %v365_v22 = vld [vmem:[#allocation7 + $0x70] sm:$0xff]  ;;  %v364_v23 = vld [vmem:[#allocation7 + $0x68] sm:$0xff] }
  0x3b   :  { %627 = vmatmul.mubr.msk.f32.vlgmr.msra.gmra.mxu1 %vm174_vm3, %v92_v5  ;;  %632 = vmatpush3.msra.mxu0 %v271_v6  ;;  %v260_v17 = vld [vmem:[#allocation5 + $0x18] sm:$0xff]  ;;  %v363_v24 = vld [vmem:[#allocation7 + $0x60] sm:$0xff]  ;;  %v361_v26 = vld [vmem:[#allocation7 + $0x50] sm:$0xff]  ;;  %p831_p10 = pnand %p830_p9, %p824_p6 }
  0x3c   :  { %633 = vmatprep.subr.mxu0 %v857_v0  ;;  %696 = vmatprep.mubr.msk.f32.mxu1 %vm858_vm0, %v857_v0  ;;  %v366_v21 = vld [vmem:[#allocation7 + $0x78] sm:$0xff]  ;;  %v360_v27 = vld [vmem:[#allocation7 + $0x48] sm:$0xff]  ;;  %v359_v28 = vld [vmem:[#allocation7 + $0x40] sm:$0xff] }
  0x3d   :  { %634 = vmatpush3.msra.mxu0 %v270_v7  ;;  %665 = vmatpush3.msra.mxu1 %v366_v21  ;;  %v362_v25 = vld [vmem:[#allocation7 + $0x58] sm:$0xff]  ;;  %v357_v30 = vld [vmem:[#allocation7 + $0x30] sm:$0xff]  ;;  %v356_v31 = vld [vmem:[#allocation7 + $0x28] sm:$0xff] }
  0x3e   :  { %635 = vmatprep.subr.mxu0 %v857_v0  ;;  %666 = vmatprep.subr.mxu1 %v857_v0  ;;  %v358_v29 = vld [vmem:[#allocation7 + $0x38] sm:$0xff]  ;;  %v355_v32 = vld [vmem:[#allocation7 + $0x20] sm:$0xff]  ;;  %v353_v42 = vld [vmem:[#allocation7 + $0x10] sm:$0xff] }
  0x3f   :  { %636 = vmatpush3.msra.mxu0 %v269_v8  ;;  %667 = vmatpush3.msra.mxu1 %v365_v22  ;;  %v354_v33 = vld [vmem:[#allocation7 + $0x18] sm:$0xff]  ;;  %v352_v43 = vld [vmem:[#allocation7 + $0x8] sm:$0xff]  ;;  %v351_v44 = vld [vmem:[#allocation7] sm:$0xff] }
  0x40   :  { %637 = vmatprep.subr.mxu0 %v857_v0  ;;  %668 = vmatprep.subr.mxu1 %v857_v0  ;;  %v560_v37 = vld [vmem:[%s1029_s4] ss:$0 sm:$0xff]  ;;  %v459_v46 = vld [vmem:[#allocation8 + $0x70] sm:$0xff]  ;;  %v458_v47 = vld [vmem:[#allocation8 + $0x68] sm:$0xff] }
  0x41   :  { %638 = vmatpush3.msra.mxu0 %v268_v9  ;;  %669 = vmatpush3.msra.mxu1 %v364_v23  ;;  %v460_v45 = vld [vmem:[#allocation8 + $0x78] sm:$0xff]  ;;  %v457_v48 = vld [vmem:[#allocation8 + $0x60] sm:$0xff]  ;;  %v455_v50 = vld [vmem:[#allocation8 + $0x50] sm:$0xff] }
  0x42   :  { %639 = vmatprep.subr.mxu0 %v857_v0  ;;  %670 = vmatprep.subr.mxu1 %v857_v0  ;;  %v456_v49 = vld [vmem:[#allocation8 + $0x58] sm:$0xff]  ;;  %v454_v51 = vld [vmem:[#allocation8 + $0x48] sm:$0xff]  ;;  %v453_v52 = vld [vmem:[#allocation8 + $0x40] sm:$0xff] }
  0x43   :  { %640 = vmatpush3.msra.mxu0 %v267_v10  ;;  %671 = vmatpush3.msra.mxu1 %v363_v24  ;;  %v452_v53 = vld [vmem:[#allocation8 + $0x38] sm:$0xff]  ;;  %v451_v54 = vld [vmem:[#allocation8 + $0x30] sm:$0xff]  ;;  %v450_v55 = vld [vmem:[#allocation8 + $0x28] sm:$0xff] }
  0x44   :  { %641 = vmatprep.subr.mxu0 %v857_v0  ;;  %672 = vmatprep.subr.mxu1 %v857_v0  ;;  %v449_v56 = vld [vmem:[#allocation8 + $0x20] sm:$0xff]  ;;  %v448_v57 = vld [vmem:[#allocation8 + $0x18] sm:$0xff]  ;;  %v447_v63 = vld [vmem:[#allocation8 + $0x10] sm:$0xff] }
  0x45   :  { %642 = vmatpush3.msra.mxu0 %v266_v11  ;;  %673 = vmatpush3.msra.mxu1 %v362_v25  ;;  %v561_v58 = vld [vmem:[%s1031_s6] ss:$0 sm:$0xff]  ;;  %v446_v1 = vld [vmem:[#allocation8 + $0x8] sm:$0xff]  ;;  %v445_v2 = vld [vmem:[#allocation8] sm:$0xff] }
  0x46   :  { %643 = vmatprep.subr.mxu0 %v857_v0  ;;  %674 = vmatprep.subr.mxu1 %v857_v0  ;;  %v562_v3 = vld [vmem:[%s1033_s8] ss:$0 sm:$0xff] }
  0x47   :  { %644 = vmatpush3.msra.mxu0 %v265_v12  ;;  %675 = vmatpush3.msra.mxu1 %v361_v26  ;;  %v563_v8 = vld [vmem:[%s1035_s10] ss:$0 sm:$0xff] }
  0x48   :  { %645 = vmatprep.subr.mxu0 %v857_v0  ;;  %676 = vmatprep.subr.mxu1 %v857_v0 }
  0x49   :  { %646 = vmatpush3.msra.mxu0 %v264_v13  ;;  %677 = vmatpush3.msra.mxu1 %v360_v27 }
  0x4a   :  { %647 = vmatprep.subr.mxu0 %v857_v0  ;;  %678 = vmatprep.subr.mxu1 %v857_v0 }
  0x4b   :  { %648 = vmatpush3.msra.mxu0 %v263_v14  ;;  %679 = vmatpush3.msra.mxu1 %v359_v28 }
  0x4c   :  { %649 = vmatprep.subr.mxu0 %v857_v0  ;;  %680 = vmatprep.subr.mxu1 %v857_v0 }
  0x4d   :  { %650 = vmatpush3.msra.mxu0 %v262_v15  ;;  %681 = vmatpush3.msra.mxu1 %v358_v29 }
  0x4e   :  { %651 = vmatprep.subr.mxu0 %v857_v0  ;;  %682 = vmatprep.subr.mxu1 %v857_v0 }
  0x4f   :  { %652 = vmatpush3.msra.mxu0 %v261_v16  ;;  %683 = vmatpush3.msra.mxu1 %v357_v30 }
  0x50   :  { %653 = vmatprep.subr.mxu0 %v857_v0  ;;  %684 = vmatprep.subr.mxu1 %v857_v0 }
  0x51   :  { %654 = vmatpush3.msra.mxu0 %v260_v17  ;;  %685 = vmatpush3.msra.mxu1 %v356_v31 }
  0x52   :  { %655 = vmatprep.subr.mxu0 %v857_v0  ;;  %686 = vmatprep.subr.mxu1 %v857_v0 }
  0x53   :  { %656 = vmatpush3.msra.mxu0 %v259_v18  ;;  %687 = vmatpush3.msra.mxu1 %v355_v32 }
  0x54   :  { %657 = vmatprep.subr.mxu0 %v857_v0  ;;  %688 = vmatprep.subr.mxu1 %v857_v0 }
  0x55   :  { %658 = vmatpush3.msra.mxu0 %v258_v19  ;;  %689 = vmatpush3.msra.mxu1 %v354_v33 }
  0x56   :  { %659 = vmatprep.subr.mxu0 %v857_v0  ;;  %690 = vmatprep.subr.mxu1 %v857_v0 }
  0x57   :  { %660 = vmatpush3.msra.mxu0 %v257_v20  ;;  %691 = vmatpush3.msra.mxu1 %v353_v42 }
  0x58   :  { %699 = vmatprep.subr.mxu0 %v857_v0  ;;  %692 = vmatprep.subr.mxu1 %v857_v0 }
  0x59   :  { %693 = vmatpush3.msra.mxu1 %v352_v43 }
  0x5a   :  { %694 = vmatprep.subr.mxu1 %v857_v0 }
  0x5b   :  { %695 = vmatpush3.msra.mxu1 %v351_v44 }
  0xf7   :  { %v170_v34 = vpop.f32.mrf.mxu1 }
  0xf9   :  { %v623_v35 = vpop.f32.mrf.mxu1 }
  0xfb   :  { %v244_v36 = vpop.f32.mrf.mxu1 }
  0xfc   :  { %v245_v38 = vadd.f32 %v244_v36, %v170_v34 }
  0xfd   :  { %v628_v39 = vpop.f32.mrf.mxu1 }
  0xfe   :  { %v255_v40 = vadd.f32 %v560_v37, %v245_v38 }
 0x100   :  { %v256_v41 = vmax.f32 %v255_v40, 0.0 }
 0x102   :  { %662 = vmatmul.mubr.f32.vlgmr.msra.gmra.mxu0 %v256_v41 }
 0x103   :  { %731 = vmatprep.mubr.msk.f32.mxu0 %vm858_vm0, %v857_v0  ;;  %700 = vmatpush3.msra.mxu0 %v460_v45 }
 0x104   :  { %701 = vmatprep.subr.mxu0 %v857_v0 }
 0x105   :  { %702 = vmatpush3.msra.mxu0 %v459_v46 }
 0x106   :  { %703 = vmatprep.subr.mxu0 %v857_v0 }
 0x107   :  { %704 = vmatpush3.msra.mxu0 %v458_v47 }
 0x108   :  { %705 = vmatprep.subr.mxu0 %v857_v0 }
 0x109   :  { %706 = vmatpush3.msra.mxu0 %v457_v48 }
 0x10a   :  { %707 = vmatprep.subr.mxu0 %v857_v0 }
 0x10b   :  { %708 = vmatpush3.msra.mxu0 %v456_v49 }
 0x10c   :  { %709 = vmatprep.subr.mxu0 %v857_v0 }
 0x10d   :  { %710 = vmatpush3.msra.mxu0 %v455_v50 }
 0x10e   :  { %711 = vmatprep.subr.mxu0 %v857_v0 }
 0x10f   :  { %712 = vmatpush3.msra.mxu0 %v454_v51 }
 0x110   :  { %713 = vmatprep.subr.mxu0 %v857_v0 }
 0x111   :  { %714 = vmatpush3.msra.mxu0 %v453_v52 }
 0x112   :  { %715 = vmatprep.subr.mxu0 %v857_v0 }
 0x113   :  { %716 = vmatpush3.msra.mxu0 %v452_v53 }
 0x114   :  { %717 = vmatprep.subr.mxu0 %v857_v0 }
 0x115   :  { %718 = vmatpush3.msra.mxu0 %v451_v54 }
 0x116   :  { %719 = vmatprep.subr.mxu0 %v857_v0 }
 0x117   :  { %720 = vmatpush3.msra.mxu0 %v450_v55 }
 0x118   :  { %721 = vmatprep.subr.mxu0 %v857_v0 }
 0x119   :  { %722 = vmatpush3.msra.mxu0 %v449_v56 }
 0x11a   :  { %723 = vmatprep.subr.mxu0 %v857_v0 }
 0x11b   :  { %724 = vmatpush3.msra.mxu0 %v448_v57 }
 0x11c   :  { %725 = vmatprep.subr.mxu0 %v857_v0 }
 0x11d   :  { %726 = vmatpush3.msra.mxu0 %v447_v63 }
 0x11e   :  { %727 = vmatprep.subr.mxu0 %v857_v0 }
 0x11f   :  { %728 = vmatpush3.msra.mxu0 %v446_v1 }
 0x120   :  { %729 = vmatprep.subr.mxu0 %v857_v0 }
 0x121   :  { %730 = vmatpush3.msra.mxu0 %v445_v2 }
 0x1c2   :  { %v346_v59 = vpop.f32.mrf.mxu0 }
 0x1c3   :  { %v347_v60 = vadd.f32 %v561_v58, %v346_v59 }
 0x1c4   :  { %v663_v61 = vpop.f32.mrf.mxu0 }
 0x1c5   :  { %v350_v62 = vmax.f32 %v347_v60, 0.0 }
 0x1c7   :  { %697 = vmatmul.mubr.f32.vlgmr.msra.gmra.mxu1 %v350_v62 }
 0x287   :  { %v440_v4 = vpop.f32.mrf.mxu1 }
 0x288   :  { %v441_v5 = vadd.f32 %v562_v3, %v440_v4 }
 0x289   :  { %v698_v6 = vpop.f32.mrf.mxu1 }
 0x28a   :  { %v444_v7 = vmax.f32 %v441_v5, 0.0 }
 0x28c   :  { %732 = vmatmul.mubr.f32.vlgmr.msra.gmra.mxu0 %v444_v7 }
 0x34c   :  { %v534_v9 = vpop.f32.mrf.mxu0 }
 0x34d   :  { %v535_v0 = vadd.f32 %v563_v8, %v534_v9 }
 0x34e   :  { %v733_v10 = vpop.f32.mrf.mxu0 }
 0x34f   :  { %539 = vst.msk [vmem:[#allocation10] sm:$0xff] %vm538_vm4, %v535_v0 }
 0x350   :  { %834 = shalt.err (!%p831_p10)
}
 0x351   :  { %549 = dma.vmem_to_hbm [thread:$0]  %s547_s26, 128, %s1036_s11, [#allocation4]  }
 0x352   :  { %849 = dma.done.wait [#allocation4], 128  }
 0x353   :  { %850 = vsyncadd [#allocation4], 4294967168 }
 0x354   :  { %553 = vsyncpa [#allocation3], 1 }
 0x355   :  { %554 = vsyncpa [#allocation6], 1 }
 0x356   :  { %555 = vsyncpa [#allocation9], 1 }
 0x357   :  { %556 = vsyncpa [#allocation4], 1 }

</bundles_post_ra>
